<compile_context>
chip_gen: v7x
topology: tpu7x:2x2x1
jax: 0.10.0
libtpu: 0.0.40
codegen_flags: <defaults>
</compile_context>

<pallas_src>
import jax
import jax.numpy as jnp
from jax.experimental import pallas as pl
from jax.experimental.pallas import tpu as pltpu

M = 5
TIMESTEPS = 15
DECAY = 0.3
TAU = 2.0


def critic2_fused_kernel(x_ref, m1_init_ref, s1_init_ref,
                         w1_ref, b1_ref, w2_ref, b2_ref, w4s_ref, b4s_ref,
                         val_ref, m1_ref, s1_ref,
                         mem_all_ref):
    """Whole T-step rollout in one invocation; everything resident in VMEM."""
    B, H = m1_init_ref.shape
    T = x_ref.shape[0] // B                     # static (shapes are static)

    # ---- Hoisted batched fc1 + fresh-IFNode + fc2 over all T steps at once ----
    # (x_spike depends only on the inputs, never on the carried state.)
    x_all = x_ref[...]                                                     # (T*B, IN)
    z1 = jnp.dot(x_all, w1_ref[...], preferred_element_type=jnp.float32) + b1_ref[...]
    x_spike = (z1 >= 1.0).astype(jnp.float32)                             # heaviside(v - 1)
    z2_all = (jnp.dot(x_spike, w2_ref[...], preferred_element_type=jnp.float32)
              + b2_ref[...])                                               # (T*B, H)

    # ---- Serial elementwise membrane / spike recurrence (no matmuls, no DMAs) ----
    mem = m1_init_ref[...]
    spike = s1_init_ref[...]
    for t in range(T):                          # T is a static 15 -> fully unrolled
        z2_t = z2_all[t * B:(t + 1) * B, :]
        # mem*decay*(1-spike) + fc2(x_spike), without materializing (1 - spike).
        mem = (mem - mem * spike) * DECAY + z2_t
        spike = (mem > 1.0).astype(jnp.float32)  # AtanGrad surrogate forward = heaviside
        mem_all_ref[t * B:(t + 1) * B, :] = mem  # static-offset store into VMEM scratch

    m1_ref[...] = mem
    s1_ref[...] = spike

    # ---- Batched value head: fc4 (1/tau pre-folded) over all T steps at once ----
    val_ref[...] = (jnp.dot(mem_all_ref[...], w4s_ref[...],
                            preferred_element_type=jnp.float32) + b4s_ref[...])


def critic2_forward_rollout(inputs_seq, h1_mem, h1_spike, h2_mem, h2_spike,
                            params, rnn_hidden_dim):
    """Apply the module forward TIMESTEPS times inside a single grid-less pallas_call.

    inputs_seq: (T, B, input_shape) per-step inputs.
    Returns (values (T, B, n_actions), h1_mem, h1_spike, h2_mem, h2_spike) with
    h1_* being the state after the last step; h2_* pass through (reshaped only).
    """
    # else-branch reshape glue (alg != 'siql_e')
    h1_mem = h1_mem.reshape(-1, rnn_hidden_dim)
    h1_spike = h1_spike.reshape(-1, rnn_hidden_dim)
    h2_mem = h2_mem.reshape(-1, rnn_hidden_dim)
    h2_spike = h2_spike.reshape(-1, rnn_hidden_dim)

    w1, b1, w2, b2, w4, b4 = params
    # Fold the static 1/tau of BCNoSpikingLIFNode(tau=2.0) into fc4 params (exact: tau=2).
    w4s = w4 * (1.0 / TAU)
    b4s = b4 * (1.0 / TAU)

    T, B, IN = inputs_seq.shape
    H = w2.shape[1]
    A = w4.shape[1]

    x_flat = inputs_seq.reshape(T * B, IN)      # wrapper-side reshape (cheap XLA op)

    def vmem_spec():
        return pl.BlockSpec(memory_space=pltpu.MemorySpace.VMEM)

    values_flat, h1_mem_new, h1_spike_new = pl.pallas_call(
        critic2_fused_kernel,
        out_shape=(
            jax.ShapeDtypeStruct((T * B, A), jnp.float32),
            jax.ShapeDtypeStruct((B, H), jnp.float32),
            jax.ShapeDtypeStruct((B, H), jnp.float32),
        ),
        in_specs=[vmem_spec() for _ in range(9)],
        out_specs=(vmem_spec(), vmem_spec(), vmem_spec()),
        scratch_shapes=[pltpu.VMEM((T * B, H), jnp.float32)],
    )(x_flat, h1_mem, h1_spike, w1, b1, w2, b2, w4s, b4s)

    values = values_flat.reshape(T, B, A)
    return values, h1_mem_new, h1_spike_new, h2_mem, h2_spike


def critic2_forward(inputs, h1_mem, h1_spike, h2_mem, h2_spike, params, rnn_hidden_dim):
    """Single-step forward (exact module signature) — T=1 call of the fused kernel."""
    values, m1, s1, m2, s2 = critic2_forward_rollout(
        inputs[None], h1_mem, h1_spike, h2_mem, h2_spike, params, rnn_hidden_dim)
    return values[0], m1, s1, m2, s2


def _reference_step(inputs, h1_mem, h1_spike, params):
    """Pure-JAX reference for one module forward (mirrors the PyTorch code)."""
    w1, b1, w2, b2, w4, b4 = params
    hi = jax.lax.Precision.HIGHEST
    z1 = jnp.dot(inputs, w1, precision=hi) + b1
    x_spike = (z1 - 1.0 >= 0.0).astype(jnp.float32)
    mem = h1_mem * DECAY * (1.0 - h1_spike) + jnp.dot(x_spike, w2, precision=hi) + b2
    spike = (mem - 1.0 > 0.0).astype(jnp.float32)
    value = (jnp.dot(mem, w4, precision=hi) + b4) / TAU
    return value, mem, spike


if __name__ == "__main__":
    # Small shapes consistent with the module: batch=8, input_shape=16,
    # ppo_hidden_size = rnn_hidden_dim = 32, n_actions = M = 5, T = TIMESTEPS = 15.
    B, IN, H, A = 8, 16, 32, M
    T = TIMESTEPS
    key = jax.random.PRNGKey(0)
    ks = jax.random.split(key, 12)

    # Deterministic synthetic parameters (weights stored as (in, out) = W.T).
    w1 = jax.random.normal(ks[0], (IN, H), jnp.float32) * 0.3
    b1 = jax.random.normal(ks[1], (1, H), jnp.float32) * 0.1
    w2 = jax.random.normal(ks[2], (H, H), jnp.float32) * 0.3
    b2 = jax.random.normal(ks[3], (1, H), jnp.float32) * 0.1
    w4 = jax.random.normal(ks[4], (H, A), jnp.float32) * 0.3
    b4 = jax.random.normal(ks[5], (1, A), jnp.float32) * 0.1
    params = (w1, b1, w2, b2, w4, b4)

    inputs_seq = jax.random.normal(ks[6], (T, B, IN), jnp.float32)
    h1_mem0 = jax.random.normal(ks[7], (B, H), jnp.float32)
    h1_spike0 = (jax.random.uniform(ks[8], (B, H)) > 0.5).astype(jnp.float32)
    h2_mem0 = jax.random.normal(ks[9], (B, H), jnp.float32)
    h2_spike0 = (jax.random.uniform(ks[10], (B, H)) > 0.5).astype(jnp.float32)

    # ---- Fused 15-step rollout (one grid-less pallas_call) ----
    values, m1, s1, m2, s2 = critic2_forward_rollout(
        inputs_seq, h1_mem0, h1_spike0, h2_mem0, h2_spike0, params, rnn_hidden_dim=H)
    jax.block_until_ready((values, m1, s1, m2, s2))

    # Pure-JAX reference: call the single-step module forward T times.
    v_ref_list = []
    m_ref, s_ref = h1_mem0, h1_spike0
    for t in range(T):
        v_t, m_ref, s_ref = _reference_step(inputs_seq[t], m_ref, s_ref, params)
        v_ref_list.append(v_t)
    v_ref = jnp.stack(v_ref_list)

    assert jnp.allclose(values, v_ref, atol=1e-5), "rollout value mismatch"
    assert jnp.allclose(m1, m_ref, atol=1e-5), "rollout h1_mem mismatch"
    assert jnp.allclose(s1, s_ref), "rollout h1_spike mismatch"
    assert values.shape == (T, B, A) and m1.shape == (B, H) and s1.shape == (B, H)
    assert m2.shape == (B, H) and s2.shape == (B, H)

    # ---- Single-step path (module's original forward signature) ----
    v1, m1a, s1a, _, _ = critic2_forward(
        inputs_seq[0], h1_mem0, h1_spike0, h2_mem0, h2_spike0, params, rnn_hidden_dim=H)
    v1r, m1r, s1r = _reference_step(inputs_seq[0], h1_mem0, h1_spike0, params)
    jax.block_until_ready((v1, m1a, s1a))
    assert jnp.allclose(v1, v1r, atol=1e-5), "single-step value mismatch"
    assert jnp.allclose(m1a, m1r, atol=1e-5), "single-step h1_mem mismatch"
    assert jnp.allclose(s1a, s1r), "single-step h1_spike mismatch"

    # TODO(synk): 'siql_e' branch (4-D reshape of h1/h2 state) and AtanGrad's
    # backward surrogate gradient are not implemented (forward-only kernel).

    print("KERNEL_OK")
</pallas_src>

<mosaic_0001>
module attributes {stable_mosaic.version = 11 : i64} {
  func.func @critic2_fused_kernel(%arg0: memref<120x16xf32, #tpu.memory_space<vmem>>, %arg1: memref<8x32xf32, #tpu.memory_space<vmem>>, %arg2: memref<8x32xf32, #tpu.memory_space<vmem>>, %arg3: memref<16x32xf32, #tpu.memory_space<vmem>>, %arg4: memref<1x32xf32, #tpu.memory_space<vmem>>, %arg5: memref<32x32xf32, #tpu.memory_space<vmem>>, %arg6: memref<1x32xf32, #tpu.memory_space<vmem>>, %arg7: memref<32x5xf32, #tpu.memory_space<vmem>>, %arg8: memref<1x5xf32, #tpu.memory_space<vmem>>, %arg9: memref<120x5xf32, #tpu.memory_space<vmem>>, %arg10: memref<8x32xf32, #tpu.memory_space<vmem>>, %arg11: memref<8x32xf32, #tpu.memory_space<vmem>>, %arg12: memref<120x32xf32, #tpu.memory_space<vmem>>) attributes {dimension_semantics = [], scalar_prefetch = 0 : i64, scratch_operands = 1 : i64, tpu.core_type = #tpu.core_type<tc>} {
    %c0 = arith.constant 0 : index
    %c0_0 = arith.constant 0 : index
    %0 = vector.load %arg0[%c0, %c0_0] : memref<120x16xf32, #tpu.memory_space<vmem>>, vector<120x16xf32>
    %c0_1 = arith.constant 0 : index
    %c0_2 = arith.constant 0 : index
    %1 = vector.load %arg3[%c0_1, %c0_2] : memref<16x32xf32, #tpu.memory_space<vmem>>, vector<16x32xf32>
    %cst = arith.constant dense<0.000000e+00> : vector<120x32xf32>
    %2 = tpu.matmul %0, %1, %cst {dimension_numbers = #tpu.dot_dimension_numbers<[1], [0], [0], [1], [0, 0, 1, 1], [], []>} : vector<120x16xf32>, vector<16x32xf32>, vector<120x32xf32> -> vector<120x32xf32>
    %c0_3 = arith.constant 0 : index
    %c0_4 = arith.constant 0 : index
    %3 = vector.load %arg4[%c0_3, %c0_4] : memref<1x32xf32, #tpu.memory_space<vmem>>, vector<1x32xf32>
    %4 = vector.broadcast %3 : vector<1x32xf32> to vector<120x32xf32>
    %5 = arith.addf %2, %4 : vector<120x32xf32>
    %cst_5 = arith.constant 1.000000e+00 : f32
    %6 = vector.broadcast %cst_5 : f32 to vector<120x32xf32>
    %7 = arith.cmpf oge, %5, %6 : vector<120x32xf32>
    %8 = arith.extui %7 : vector<120x32xi1> to vector<120x32xi32>
    %9 = arith.sitofp %8 : vector<120x32xi32> to vector<120x32xf32>
    %c0_6 = arith.constant 0 : index
    %c0_7 = arith.constant 0 : index
    %10 = vector.load %arg5[%c0_6, %c0_7] : memref<32x32xf32, #tpu.memory_space<vmem>>, vector<32x32xf32>
    %cst_8 = arith.constant dense<0.000000e+00> : vector<120x32xf32>
    %11 = tpu.matmul %9, %10, %cst_8 {dimension_numbers = #tpu.dot_dimension_numbers<[1], [0], [0], [1], [0, 0, 1, 1], [], []>} : vector<120x32xf32>, vector<32x32xf32>, vector<120x32xf32> -> vector<120x32xf32>
    %c0_9 = arith.constant 0 : index
    %c0_10 = arith.constant 0 : index
    %12 = vector.load %arg6[%c0_9, %c0_10] : memref<1x32xf32, #tpu.memory_space<vmem>>, vector<1x32xf32>
    %13 = vector.broadcast %12 : vector<1x32xf32> to vector<120x32xf32>
    %14 = arith.addf %11, %13 : vector<120x32xf32>
    %c0_11 = arith.constant 0 : index
    %c0_12 = arith.constant 0 : index
    %15 = vector.load %arg1[%c0_11, %c0_12] : memref<8x32xf32, #tpu.memory_space<vmem>>, vector<8x32xf32>
    %c0_13 = arith.constant 0 : index
    %c0_14 = arith.constant 0 : index
    %16 = vector.load %arg2[%c0_13, %c0_14] : memref<8x32xf32, #tpu.memory_space<vmem>>, vector<8x32xf32>
    %17 = vector.extract_strided_slice %14 {offsets = [0, 0], sizes = [8, 32], strides = [1, 1]} : vector<120x32xf32> to vector<8x32xf32>
    %18 = arith.mulf %15, %16 : vector<8x32xf32>
    %19 = arith.subf %15, %18 : vector<8x32xf32>
    %cst_15 = arith.constant 3.000000e-01 : f32
    %20 = vector.broadcast %cst_15 : f32 to vector<8x32xf32>
    %21 = arith.mulf %19, %20 : vector<8x32xf32>
    %22 = arith.addf %21, %17 : vector<8x32xf32>
    %cst_16 = arith.constant 1.000000e+00 : f32
    %23 = vector.broadcast %cst_16 : f32 to vector<8x32xf32>
    %24 = arith.cmpf ogt, %22, %23 : vector<8x32xf32>
    %25 = arith.extui %24 : vector<8x32xi1> to vector<8x32xi32>
    %26 = arith.sitofp %25 : vector<8x32xi32> to vector<8x32xf32>
    %c0_17 = arith.constant 0 : index
    %c0_18 = arith.constant 0 : index
    %27 = vector.load %arg12[%c0_17, %c0_18] : memref<120x32xf32, #tpu.memory_space<vmem>>, vector<8x32xf32>
    tpu.vector_store %arg12[%c0_17, %c0_18], %22 {strides = array<i32>} : memref<120x32xf32, #tpu.memory_space<vmem>>, vector<8x32xf32>,
    %28 = vector.extract_strided_slice %14 {offsets = [8, 0], sizes = [8, 32], strides = [1, 1]} : vector<120x32xf32> to vector<8x32xf32>
    %29 = arith.mulf %22, %26 : vector<8x32xf32>
    %30 = arith.subf %22, %29 : vector<8x32xf32>
    %cst_19 = arith.constant 3.000000e-01 : f32
    %31 = vector.broadcast %cst_19 : f32 to vector<8x32xf32>
    %32 = arith.mulf %30, %31 : vector<8x32xf32>
    %33 = arith.addf %32, %28 : vector<8x32xf32>
    %cst_20 = arith.constant 1.000000e+00 : f32
    %34 = vector.broadcast %cst_20 : f32 to vector<8x32xf32>
    %35 = arith.cmpf ogt, %33, %34 : vector<8x32xf32>
    %36 = arith.extui %35 : vector<8x32xi1> to vector<8x32xi32>
    %37 = arith.sitofp %36 : vector<8x32xi32> to vector<8x32xf32>
    %c8 = arith.constant 8 : index
    %c0_21 = arith.constant 0 : index
    %38 = vector.load %arg12[%c8, %c0_21] : memref<120x32xf32, #tpu.memory_space<vmem>>, vector<8x32xf32>
    tpu.vector_store %arg12[%c8, %c0_21], %33 {strides = array<i32>} : memref<120x32xf32, #tpu.memory_space<vmem>>, vector<8x32xf32>,
    %39 = vector.extract_strided_slice %14 {offsets = [16, 0], sizes = [8, 32], strides = [1, 1]} : vector<120x32xf32> to vector<8x32xf32>
    %40 = arith.mulf %33, %37 : vector<8x32xf32>
    %41 = arith.subf %33, %40 : vector<8x32xf32>
    %cst_22 = arith.constant 3.000000e-01 : f32
    %42 = vector.broadcast %cst_22 : f32 to vector<8x32xf32>
    %43 = arith.mulf %41, %42 : vector<8x32xf32>
    %44 = arith.addf %43, %39 : vector<8x32xf32>
    %cst_23 = arith.constant 1.000000e+00 : f32
    %45 = vector.broadcast %cst_23 : f32 to vector<8x32xf32>
    %46 = arith.cmpf ogt, %44, %45 : vector<8x32xf32>
    %47 = arith.extui %46 : vector<8x32xi1> to vector<8x32xi32>
    %48 = arith.sitofp %47 : vector<8x32xi32> to vector<8x32xf32>
    %c16 = arith.constant 16 : index
    %c0_24 = arith.constant 0 : index
    %49 = vector.load %arg12[%c16, %c0_24] : memref<120x32xf32, #tpu.memory_space<vmem>>, vector<8x32xf32>
    tpu.vector_store %arg12[%c16, %c0_24], %44 {strides = array<i32>} : memref<120x32xf32, #tpu.memory_space<vmem>>, vector<8x32xf32>,
    %50 = vector.extract_strided_slice %14 {offsets = [24, 0], sizes = [8, 32], strides = [1, 1]} : vector<120x32xf32> to vector<8x32xf32>
    %51 = arith.mulf %44, %48 : vector<8x32xf32>
    %52 = arith.subf %44, %51 : vector<8x32xf32>
    %cst_25 = arith.constant 3.000000e-01 : f32
    %53 = vector.broadcast %cst_25 : f32 to vector<8x32xf32>
    %54 = arith.mulf %52, %53 : vector<8x32xf32>
    %55 = arith.addf %54, %50 : vector<8x32xf32>
    %cst_26 = arith.constant 1.000000e+00 : f32
    %56 = vector.broadcast %cst_26 : f32 to vector<8x32xf32>
    %57 = arith.cmpf ogt, %55, %56 : vector<8x32xf32>
    %58 = arith.extui %57 : vector<8x32xi1> to vector<8x32xi32>
    %59 = arith.sitofp %58 : vector<8x32xi32> to vector<8x32xf32>
    %c24 = arith.constant 24 : index
    %c0_27 = arith.constant 0 : index
    %60 = vector.load %arg12[%c24, %c0_27] : memref<120x32xf32, #tpu.memory_space<vmem>>, vector<8x32xf32>
    tpu.vector_store %arg12[%c24, %c0_27], %55 {strides = array<i32>} : memref<120x32xf32, #tpu.memory_space<vmem>>, vector<8x32xf32>,
    %61 = vector.extract_strided_slice %14 {offsets = [32, 0], sizes = [8, 32], strides = [1, 1]} : vector<120x32xf32> to vector<8x32xf32>
    %62 = arith.mulf %55, %59 : vector<8x32xf32>
    %63 = arith.subf %55, %62 : vector<8x32xf32>
    %cst_28 = arith.constant 3.000000e-01 : f32
    %64 = vector.broadcast %cst_28 : f32 to vector<8x32xf32>
    %65 = arith.mulf %63, %64 : vector<8x32xf32>
    %66 = arith.addf %65, %61 : vector<8x32xf32>
    %cst_29 = arith.constant 1.000000e+00 : f32
    %67 = vector.broadcast %cst_29 : f32 to vector<8x32xf32>
    %68 = arith.cmpf ogt, %66, %67 : vector<8x32xf32>
    %69 = arith.extui %68 : vector<8x32xi1> to vector<8x32xi32>
    %70 = arith.sitofp %69 : vector<8x32xi32> to vector<8x32xf32>
    %c32 = arith.constant 32 : index
    %c0_30 = arith.constant 0 : index
    %71 = vector.load %arg12[%c32, %c0_30] : memref<120x32xf32, #tpu.memory_space<vmem>>, vector<8x32xf32>
    tpu.vector_store %arg12[%c32, %c0_30], %66 {strides = array<i32>} : memref<120x32xf32, #tpu.memory_space<vmem>>, vector<8x32xf32>,
    %72 = vector.extract_strided_slice %14 {offsets = [40, 0], sizes = [8, 32], strides = [1, 1]} : vector<120x32xf32> to vector<8x32xf32>
    %73 = arith.mulf %66, %70 : vector<8x32xf32>
    %74 = arith.subf %66, %73 : vector<8x32xf32>
    %cst_31 = arith.constant 3.000000e-01 : f32
    %75 = vector.broadcast %cst_31 : f32 to vector<8x32xf32>
    %76 = arith.mulf %74, %75 : vector<8x32xf32>
    %77 = arith.addf %76, %72 : vector<8x32xf32>
    %cst_32 = arith.constant 1.000000e+00 : f32
    %78 = vector.broadcast %cst_32 : f32 to vector<8x32xf32>
    %79 = arith.cmpf ogt, %77, %78 : vector<8x32xf32>
    %80 = arith.extui %79 : vector<8x32xi1> to vector<8x32xi32>
    %81 = arith.sitofp %80 : vector<8x32xi32> to vector<8x32xf32>
    %c40 = arith.constant 40 : index
    %c0_33 = arith.constant 0 : index
    %82 = vector.load %arg12[%c40, %c0_33] : memref<120x32xf32, #tpu.memory_space<vmem>>, vector<8x32xf32>
    tpu.vector_store %arg12[%c40, %c0_33], %77 {strides = array<i32>} : memref<120x32xf32, #tpu.memory_space<vmem>>, vector<8x32xf32>,
    %83 = vector.extract_strided_slice %14 {offsets = [48, 0], sizes = [8, 32], strides = [1, 1]} : vector<120x32xf32> to vector<8x32xf32>
    %84 = arith.mulf %77, %81 : vector<8x32xf32>
    %85 = arith.subf %77, %84 : vector<8x32xf32>
    %cst_34 = arith.constant 3.000000e-01 : f32
    %86 = vector.broadcast %cst_34 : f32 to vector<8x32xf32>
    %87 = arith.mulf %85, %86 : vector<8x32xf32>
    %88 = arith.addf %87, %83 : vector<8x32xf32>
    %cst_35 = arith.constant 1.000000e+00 : f32
    %89 = vector.broadcast %cst_35 : f32 to vector<8x32xf32>
    %90 = arith.cmpf ogt, %88, %89 : vector<8x32xf32>
    %91 = arith.extui %90 : vector<8x32xi1> to vector<8x32xi32>
    %92 = arith.sitofp %91 : vector<8x32xi32> to vector<8x32xf32>
    %c48 = arith.constant 48 : index
    %c0_36 = arith.constant 0 : index
    %93 = vector.load %arg12[%c48, %c0_36] : memref<120x32xf32, #tpu.memory_space<vmem>>, vector<8x32xf32>
    tpu.vector_store %arg12[%c48, %c0_36], %88 {strides = array<i32>} : memref<120x32xf32, #tpu.memory_space<vmem>>, vector<8x32xf32>,
    %94 = vector.extract_strided_slice %14 {offsets = [56, 0], sizes = [8, 32], strides = [1, 1]} : vector<120x32xf32> to vector<8x32xf32>
    %95 = arith.mulf %88, %92 : vector<8x32xf32>
    %96 = arith.subf %88, %95 : vector<8x32xf32>
    %cst_37 = arith.constant 3.000000e-01 : f32
    %97 = vector.broadcast %cst_37 : f32 to vector<8x32xf32>
    %98 = arith.mulf %96, %97 : vector<8x32xf32>
    %99 = arith.addf %98, %94 : vector<8x32xf32>
    %cst_38 = arith.constant 1.000000e+00 : f32
    %100 = vector.broadcast %cst_38 : f32 to vector<8x32xf32>
    %101 = arith.cmpf ogt, %99, %100 : vector<8x32xf32>
    %102 = arith.extui %101 : vector<8x32xi1> to vector<8x32xi32>
    %103 = arith.sitofp %102 : vector<8x32xi32> to vector<8x32xf32>
    %c56 = arith.constant 56 : index
    %c0_39 = arith.constant 0 : index
    %104 = vector.load %arg12[%c56, %c0_39] : memref<120x32xf32, #tpu.memory_space<vmem>>, vector<8x32xf32>
    tpu.vector_store %arg12[%c56, %c0_39], %99 {strides = array<i32>} : memref<120x32xf32, #tpu.memory_space<vmem>>, vector<8x32xf32>,
    %105 = vector.extract_strided_slice %14 {offsets = [64, 0], sizes = [8, 32], strides = [1, 1]} : vector<120x32xf32> to vector<8x32xf32>
    %106 = arith.mulf %99, %103 : vector<8x32xf32>
    %107 = arith.subf %99, %106 : vector<8x32xf32>
    %cst_40 = arith.constant 3.000000e-01 : f32
    %108 = vector.broadcast %cst_40 : f32 to vector<8x32xf32>
    %109 = arith.mulf %107, %108 : vector<8x32xf32>
    %110 = arith.addf %109, %105 : vector<8x32xf32>
    %cst_41 = arith.constant 1.000000e+00 : f32
    %111 = vector.broadcast %cst_41 : f32 to vector<8x32xf32>
    %112 = arith.cmpf ogt, %110, %111 : vector<8x32xf32>
    %113 = arith.extui %112 : vector<8x32xi1> to vector<8x32xi32>
    %114 = arith.sitofp %113 : vector<8x32xi32> to vector<8x32xf32>
    %c64 = arith.constant 64 : index
    %c0_42 = arith.constant 0 : index
    %115 = vector.load %arg12[%c64, %c0_42] : memref<120x32xf32, #tpu.memory_space<vmem>>, vector<8x32xf32>
    tpu.vector_store %arg12[%c64, %c0_42], %110 {strides = array<i32>} : memref<120x32xf32, #tpu.memory_space<vmem>>, vector<8x32xf32>,
    %116 = vector.extract_strided_slice %14 {offsets = [72, 0], sizes = [8, 32], strides = [1, 1]} : vector<120x32xf32> to vector<8x32xf32>
    %117 = arith.mulf %110, %114 : vector<8x32xf32>
    %118 = arith.subf %110, %117 : vector<8x32xf32>
    %cst_43 = arith.constant 3.000000e-01 : f32
    %119 = vector.broadcast %cst_43 : f32 to vector<8x32xf32>
    %120 = arith.mulf %118, %119 : vector<8x32xf32>
    %121 = arith.addf %120, %116 : vector<8x32xf32>
    %cst_44 = arith.constant 1.000000e+00 : f32
    %122 = vector.broadcast %cst_44 : f32 to vector<8x32xf32>
    %123 = arith.cmpf ogt, %121, %122 : vector<8x32xf32>
    %124 = arith.extui %123 : vector<8x32xi1> to vector<8x32xi32>
    %125 = arith.sitofp %124 : vector<8x32xi32> to vector<8x32xf32>
    %c72 = arith.constant 72 : index
    %c0_45 = arith.constant 0 : index
    %126 = vector.load %arg12[%c72, %c0_45] : memref<120x32xf32, #tpu.memory_space<vmem>>, vector<8x32xf32>
    tpu.vector_store %arg12[%c72, %c0_45], %121 {strides = array<i32>} : memref<120x32xf32, #tpu.memory_space<vmem>>, vector<8x32xf32>,
    %127 = vector.extract_strided_slice %14 {offsets = [80, 0], sizes = [8, 32], strides = [1, 1]} : vector<120x32xf32> to vector<8x32xf32>
    %128 = arith.mulf %121, %125 : vector<8x32xf32>
    %129 = arith.subf %121, %128 : vector<8x32xf32>
    %cst_46 = arith.constant 3.000000e-01 : f32
    %130 = vector.broadcast %cst_46 : f32 to vector<8x32xf32>
    %131 = arith.mulf %129, %130 : vector<8x32xf32>
    %132 = arith.addf %131, %127 : vector<8x32xf32>
    %cst_47 = arith.constant 1.000000e+00 : f32
    %133 = vector.broadcast %cst_47 : f32 to vector<8x32xf32>
    %134 = arith.cmpf ogt, %132, %133 : vector<8x32xf32>
    %135 = arith.extui %134 : vector<8x32xi1> to vector<8x32xi32>
    %136 = arith.sitofp %135 : vector<8x32xi32> to vector<8x32xf32>
    %c80 = arith.constant 80 : index
    %c0_48 = arith.constant 0 : index
    %137 = vector.load %arg12[%c80, %c0_48] : memref<120x32xf32, #tpu.memory_space<vmem>>, vector<8x32xf32>
    tpu.vector_store %arg12[%c80, %c0_48], %132 {strides = array<i32>} : memref<120x32xf32, #tpu.memory_space<vmem>>, vector<8x32xf32>,
    %138 = vector.extract_strided_slice %14 {offsets = [88, 0], sizes = [8, 32], strides = [1, 1]} : vector<120x32xf32> to vector<8x32xf32>
    %139 = arith.mulf %132, %136 : vector<8x32xf32>
    %140 = arith.subf %132, %139 : vector<8x32xf32>
    %cst_49 = arith.constant 3.000000e-01 : f32
    %141 = vector.broadcast %cst_49 : f32 to vector<8x32xf32>
    %142 = arith.mulf %140, %141 : vector<8x32xf32>
    %143 = arith.addf %142, %138 : vector<8x32xf32>
    %cst_50 = arith.constant 1.000000e+00 : f32
    %144 = vector.broadcast %cst_50 : f32 to vector<8x32xf32>
    %145 = arith.cmpf ogt, %143, %144 : vector<8x32xf32>
    %146 = arith.extui %145 : vector<8x32xi1> to vector<8x32xi32>
    %147 = arith.sitofp %146 : vector<8x32xi32> to vector<8x32xf32>
    %c88 = arith.constant 88 : index
    %c0_51 = arith.constant 0 : index
    %148 = vector.load %arg12[%c88, %c0_51] : memref<120x32xf32, #tpu.memory_space<vmem>>, vector<8x32xf32>
    tpu.vector_store %arg12[%c88, %c0_51], %143 {strides = array<i32>} : memref<120x32xf32, #tpu.memory_space<vmem>>, vector<8x32xf32>,
    %149 = vector.extract_strided_slice %14 {offsets = [96, 0], sizes = [8, 32], strides = [1, 1]} : vector<120x32xf32> to vector<8x32xf32>
    %150 = arith.mulf %143, %147 : vector<8x32xf32>
    %151 = arith.subf %143, %150 : vector<8x32xf32>
    %cst_52 = arith.constant 3.000000e-01 : f32
    %152 = vector.broadcast %cst_52 : f32 to vector<8x32xf32>
    %153 = arith.mulf %151, %152 : vector<8x32xf32>
    %154 = arith.addf %153, %149 : vector<8x32xf32>
    %cst_53 = arith.constant 1.000000e+00 : f32
    %155 = vector.broadcast %cst_53 : f32 to vector<8x32xf32>
    %156 = arith.cmpf ogt, %154, %155 : vector<8x32xf32>
    %157 = arith.extui %156 : vector<8x32xi1> to vector<8x32xi32>
    %158 = arith.sitofp %157 : vector<8x32xi32> to vector<8x32xf32>
    %c96 = arith.constant 96 : index
    %c0_54 = arith.constant 0 : index
    %159 = vector.load %arg12[%c96, %c0_54] : memref<120x32xf32, #tpu.memory_space<vmem>>, vector<8x32xf32>
    tpu.vector_store %arg12[%c96, %c0_54], %154 {strides = array<i32>} : memref<120x32xf32, #tpu.memory_space<vmem>>, vector<8x32xf32>,
    %160 = vector.extract_strided_slice %14 {offsets = [104, 0], sizes = [8, 32], strides = [1, 1]} : vector<120x32xf32> to vector<8x32xf32>
    %161 = arith.mulf %154, %158 : vector<8x32xf32>
    %162 = arith.subf %154, %161 : vector<8x32xf32>
    %cst_55 = arith.constant 3.000000e-01 : f32
    %163 = vector.broadcast %cst_55 : f32 to vector<8x32xf32>
    %164 = arith.mulf %162, %163 : vector<8x32xf32>
    %165 = arith.addf %164, %160 : vector<8x32xf32>
    %cst_56 = arith.constant 1.000000e+00 : f32
    %166 = vector.broadcast %cst_56 : f32 to vector<8x32xf32>
    %167 = arith.cmpf ogt, %165, %166 : vector<8x32xf32>
    %168 = arith.extui %167 : vector<8x32xi1> to vector<8x32xi32>
    %169 = arith.sitofp %168 : vector<8x32xi32> to vector<8x32xf32>
    %c104 = arith.constant 104 : index
    %c0_57 = arith.constant 0 : index
    %170 = vector.load %arg12[%c104, %c0_57] : memref<120x32xf32, #tpu.memory_space<vmem>>, vector<8x32xf32>
    tpu.vector_store %arg12[%c104, %c0_57], %165 {strides = array<i32>} : memref<120x32xf32, #tpu.memory_space<vmem>>, vector<8x32xf32>,
    %171 = vector.extract_strided_slice %14 {offsets = [112, 0], sizes = [8, 32], strides = [1, 1]} : vector<120x32xf32> to vector<8x32xf32>
    %172 = arith.mulf %165, %169 : vector<8x32xf32>
    %173 = arith.subf %165, %172 : vector<8x32xf32>
    %cst_58 = arith.constant 3.000000e-01 : f32
    %174 = vector.broadcast %cst_58 : f32 to vector<8x32xf32>
    %175 = arith.mulf %173, %174 : vector<8x32xf32>
    %176 = arith.addf %175, %171 : vector<8x32xf32>
    %cst_59 = arith.constant 1.000000e+00 : f32
    %177 = vector.broadcast %cst_59 : f32 to vector<8x32xf32>
    %178 = arith.cmpf ogt, %176, %177 : vector<8x32xf32>
    %179 = arith.extui %178 : vector<8x32xi1> to vector<8x32xi32>
    %180 = arith.sitofp %179 : vector<8x32xi32> to vector<8x32xf32>
    %c112 = arith.constant 112 : index
    %c0_60 = arith.constant 0 : index
    %181 = vector.load %arg12[%c112, %c0_60] : memref<120x32xf32, #tpu.memory_space<vmem>>, vector<8x32xf32>
    tpu.vector_store %arg12[%c112, %c0_60], %176 {strides = array<i32>} : memref<120x32xf32, #tpu.memory_space<vmem>>, vector<8x32xf32>,
    %c0_61 = arith.constant 0 : index
    %c0_62 = arith.constant 0 : index
    %182 = vector.load %arg10[%c0_61, %c0_62] : memref<8x32xf32, #tpu.memory_space<vmem>>, vector<8x32xf32>
    tpu.vector_store %arg10[%c0_61, %c0_62], %176 {strides = array<i32>} : memref<8x32xf32, #tpu.memory_space<vmem>>, vector<8x32xf32>,
    %c0_63 = arith.constant 0 : index
    %c0_64 = arith.constant 0 : index
    %183 = vector.load %arg11[%c0_63, %c0_64] : memref<8x32xf32, #tpu.memory_space<vmem>>, vector<8x32xf32>
    tpu.vector_store %arg11[%c0_63, %c0_64], %180 {strides = array<i32>} : memref<8x32xf32, #tpu.memory_space<vmem>>, vector<8x32xf32>,
    %c0_65 = arith.constant 0 : index
    %c0_66 = arith.constant 0 : index
    %184 = vector.load %arg12[%c0_65, %c0_66] : memref<120x32xf32, #tpu.memory_space<vmem>>, vector<120x32xf32>
    %c0_67 = arith.constant 0 : index
    %c0_68 = arith.constant 0 : index
    %185 = vector.load %arg7[%c0_67, %c0_68] : memref<32x5xf32, #tpu.memory_space<vmem>>, vector<32x5xf32>
    %cst_69 = arith.constant dense<0.000000e+00> : vector<120x5xf32>
    %186 = tpu.matmul %184, %185, %cst_69 {dimension_numbers = #tpu.dot_dimension_numbers<[1], [0], [0], [1], [0, 0, 1, 1], [], []>} : vector<120x32xf32>, vector<32x5xf32>, vector<120x5xf32> -> vector<120x5xf32>
    %c0_70 = arith.constant 0 : index
    %c0_71 = arith.constant 0 : index
    %187 = vector.load %arg8[%c0_70, %c0_71] : memref<1x5xf32, #tpu.memory_space<vmem>>, vector<1x5xf32>
    %188 = vector.broadcast %187 : vector<1x5xf32> to vector<120x5xf32>
    %189 = arith.addf %186, %188 : vector<120x5xf32>
    %c0_72 = arith.constant 0 : index
    %c0_73 = arith.constant 0 : index
    %190 = vector.load %arg9[%c0_72, %c0_73] : memref<120x5xf32, #tpu.memory_space<vmem>>, vector<120x5xf32>
    tpu.vector_store %arg9[%c0_72, %c0_73], %189 {strides = array<i32>} : memref<120x5xf32, #tpu.memory_space<vmem>>, vector<120x5xf32>,
    return
  }
}

</mosaic_0001>

<bundles_post_ra>
// kernel: tpu_custom_call.1
= control target key start
LH: loop header
LB: loop body
LE: loop exit
PB: predicated region body
PF: predicated region fallthrough
CT: control target
= control target key end

     0   :  { %17 = vsyncpa [#allocation4], 0  ;;  %v1230_v2 = vmov 0.0|0.0   ;;  %vm1231_vm0 = vmmov 0   ;;  %v1232_v4 = vmov 0.0   ;;  %vm61_vm1 = vcmask 130048   ;;  %s1735_s0 = inlined_call_operand.vmem [shape: f32[120,16], index: 0, kind: input, shape index: {}]   ;;  %s1736_s1 = inlined_call_operand.vmem [shape: f32[8,32], index: 1, kind: input, shape index: {}]   ;;  %s1737_s2 = inlined_call_operand.vmem [shape: f32[8,32], index: 2, kind: input, shape index: {}]   ;;  %s1738_s3 = inlined_call_operand.vmem [shape: f32[16,32], index: 3, kind: input, shape index: {}]   ;;  %s1739_s4 = inlined_call_operand.vmem [shape: f32[1,32], index: 4, kind: input, shape index: {}]   ;;  %s1740_s5 = inlined_call_operand.vmem [shape: f32[32,32], index: 5, kind: input, shape index: {}]   ;;  %s1741_s6 = inlined_call_operand.vmem [shape: f32[1,32], index: 6, kind: input, shape index: {}]   ;;  %s1742_s7 = inlined_call_operand.vmem [shape: f32[32,5], index: 7, kind: input, shape index: {}]   ;;  %s1743_s8 = inlined_call_operand.vmem [shape: f32[1,5], index: 8, kind: input, shape index: {}]   ;;  %s1744_s9 = inlined_call_operand.vmem [shape: f32[120,5], index: 9, kind: output, shape index: {0}]   ;;  %s1745_s10 = inlined_call_operand.hbm [shape: f32[8,32], index: 10, kind: output, shape index: {1}]   ;;  %s1746_s11 = inlined_call_operand.hbm [shape: f32[8,32], index: 11, kind: output, shape index: {2}]  }
   0x1   :  { %v52_v0 = vld [vmem:[%s1738_s3] sm:$0xff]  ;;  %v53_v1 = vld [vmem:[%s1738_s3 + $0x8] sm:$0xff]  ;;  %1160 = vmatprep.subr.bf16.mxu0 %v1230_v2  ;;  %1009 = vmatprep.mubr.msk.f32.mxu0 %vm1231_vm0, %v1232_v4  ;;  %v294_v9 = vld [vmem:[%s1740_s5 + $0x10] sm:$0xff] }
   0x2   :  { %v1161_v3 = vpack.c.bf16 %v53_v1, %v52_v0  ;;  %1175 = vmatprep.subr.bf16.mxu1 %v1230_v2  ;;  %1033 = vmatprep.mubr.msk.f32.mxu1 %vm1231_vm0, %v1232_v4  ;;  %v37_v5 = vld [vmem:[%s1735_s0] sm:$0xff]  ;;  %v293_v8 = vld [vmem:[%s1740_s5 + $0x8] sm:$0xff]  ;;  %v295_v10 = vld [vmem:[%s1740_s5 + $0x18] sm:$0xff] }
   0x3   :  { %v45_v6 = vld [vmem:[%s1735_s0 + $0x40] sm:$0xff]  ;;  %v38_v11 = vld [vmem:[%s1735_s0 + $0x8] sm:$0xff] }
   0x4   :  { %1162 = vmatpush3.bf16.msra.mxu0 %v1161_v3  ;;  %1176 = vmatpush3.bf16.msra.mxu1 %v1161_v3  ;;  %v292_v7 = vld [vmem:[%s1740_s5] sm:$0xff]  ;;  %v46_v12 = vld [vmem:[%s1735_s0 + $0x48] sm:$0xff] }
   0x5   :  { %1163 = vmatprep.subr.bf16.mxu1 %v1230_v2  ;;  %1169 = vmatprep.subr.bf16.mxu0 %v1230_v2  ;;  %v1164_v13 = vpack.c.bf16 %v293_v8, %v292_v7 }
   0x7   :  { %1010 = vmatmul.mubr.msk.f32.vlgmr.msra.gmra.mrb[0].mxu0 %vm61_vm1, %v37_v5  ;;  %1034 = vmatmul.mubr.msk.f32.vlgmr.msra.gmra.mrb[0].mxu1 %vm61_vm1, %v45_v6 }
   0x8   :  { %1012 = vmatprep.mubr.msk.f32.mxu0 %vm1231_vm0, %v1232_v4  ;;  %1036 = vmatprep.mubr.msk.f32.mxu1 %vm1231_vm0, %v1232_v4 }
   0x9   :  { %18 = vsyncpa [#allocation6], 0  ;;  %1165 = vmatpush3.bf16.msra.mxu1 %v1164_v13  ;;  %v1167_v14 = vpack.c.bf16 %v295_v10, %v294_v9  ;;  %v39_v15 = vld [vmem:[%s1735_s0 + $0x10] sm:$0xff]  ;;  %v40_v17 = vld [vmem:[%s1735_s0 + $0x18] sm:$0xff]  ;;  %vm303_vm2 = vcmask 261120   ;;  %s1234_s14 = smov [#allocation5]  }
   0xa   :  { %v47_v16 = vld [vmem:[%s1735_s0 + $0x50] sm:$0xff]  ;;  %1166 = vmatprep.subr.bf16.mxu1 %v1230_v2  ;;  %v48_v18 = vld [vmem:[%s1735_s0 + $0x58] sm:$0xff]  ;;  %v41_v19 = vld [vmem:[%s1735_s0 + $0x20] sm:$0xff]  ;;  %s858_s15 = sshll.u32 %s1234_s14, 4  ;;  %s859_s15 = int_to_ptr.vmem [resolvable:$true] %s858_s15 }
   0xb   :  { %1013 = vmatmul.mubr.msk.f32.gmra.mrb[2].mxu0 %vm61_vm1, %v38_v11  ;;  %1037 = vmatmul.mubr.msk.f32.gmra.mrb[2].mxu1 %vm61_vm1, %v46_v12  ;;  %v49_v20 = vld [vmem:[%s1735_s0 + $0x60] sm:$0xff]  ;;  %v42_v21 = vld [vmem:[%s1735_s0 + $0x28] sm:$0xff]  ;;  %v43_v23 = vld [vmem:[%s1735_s0 + $0x30] sm:$0xff] }
   0xc   :  { %1015 = vmatprep.mubr.msk.f32.mxu0 %vm1231_vm0, %v1232_v4  ;;  %1039 = vmatprep.mubr.msk.f32.mxu1 %vm1231_vm0, %v1232_v4  ;;  %v50_v22 = vld [vmem:[%s1735_s0 + $0x68] sm:$0xff]  ;;  %v51_v24 = vld [vmem:[%s1735_s0 + $0x70] sm:$0xff]  ;;  %v44_v25 = vld [vmem:[%s1735_s0 + $0x38] sm:$0xff] }
   0xd   :  { %1168 = vmatpush3.bf16.msra.mxu1 %v1167_v14  ;;  %v1415_v26 = vld [vmem:[%s1739_s4] ss:$0 sm:$0xff] }
   0xf   :  { %1016 = vmatmul.mubr.msk.f32.gmra.mrb[4].mxu0 %vm61_vm1, %v39_v15  ;;  %1040 = vmatmul.mubr.msk.f32.gmra.mrb[4].mxu1 %vm61_vm1, %v47_v16 }
  0x10   :  { %1018 = vmatprep.mubr.msk.f32.mxu0 %vm1231_vm0, %v1232_v4  ;;  %1042 = vmatprep.mubr.msk.f32.mxu1 %vm1231_vm0, %v1232_v4 }
  0x13   :  { %1019 = vmatmul.mubr.msk.f32.gmra.mrb[6].mxu0 %vm61_vm1, %v40_v17  ;;  %1043 = vmatmul.mubr.msk.f32.gmra.mrb[6].mxu1 %vm61_vm1, %v48_v18 }
  0x14   :  { %1021 = vmatprep.mubr.msk.f32.mxu0 %vm1231_vm0, %v1232_v4  ;;  %1045 = vmatprep.mubr.msk.f32.mxu1 %vm1231_vm0, %v1232_v4 }
  0x17   :  { %1022 = vmatmul.mubr.msk.f32.gmra.mrb[8].mxu0 %vm61_vm1, %v41_v19  ;;  %1046 = vmatmul.mubr.msk.f32.gmra.mrb[8].mxu1 %vm61_vm1, %v49_v20 }
  0x18   :  { %1024 = vmatprep.mubr.msk.f32.mxu0 %vm1231_vm0, %v1232_v4  ;;  %1048 = vmatprep.mubr.msk.f32.mxu1 %vm1231_vm0, %v1232_v4 }
  0x1b   :  { %1025 = vmatmul.mubr.msk.f32.gmra.mrb[10].mxu0 %vm61_vm1, %v42_v21  ;;  %1049 = vmatmul.mubr.msk.f32.gmra.mrb[10].mxu1 %vm61_vm1, %v50_v22 }
  0x1c   :  { %1027 = vmatprep.mubr.msk.f32.mxu0 %vm1231_vm0, %v1232_v4  ;;  %1051 = vmatprep.mubr.msk.f32.mxu1 %vm1231_vm0, %v1232_v4 }
  0x1f   :  { %1028 = vmatmul.mubr.msk.f32.gmra.mrb[12].mxu0 %vm61_vm1, %v43_v23  ;;  %1052 = vmatmul.mubr.msk.f32.gmra.mrb[12].mxu1 %vm61_vm1, %v51_v24 }
  0x20   :  { %1030 = vmatprep.mubr.msk.f32.mxu0 %vm1231_vm0, %v1232_v4  ;;  %1062 = vmatprep.mubr.msk.f32.mxu1 %vm1231_vm0, %v1232_v4 }
  0x23   :  { %1031 = vmatmul.mubr.msk.f32.gmra.mrb[14].mxu0 %vm61_vm1, %v44_v25  ;;  %v628_v25 = vld [vmem:[%s1742_s7] sm:$0xff] }
  0x24   :  { %1115 = vmatprep.mubr.msk.f32.mxu0 %vm1231_vm0, %v1232_v4 }
  0xda   :  { %v173_v27 = vpop.f32.mrb[0].mxu0  ;;  %v213_v28 = vpop.f32.mrb[0].mxu1 }
  0xdb   :  { %v174_v29 = vadd.f32 %v1415_v26, %v173_v27  ;;  %v1011_v30 = vpop.f32.mrb[1].mxu0  ;;  %v1035_v31 = vpop.f32.mrb[1].mxu1  ;;  %v214_v6 = vadd.f32 %v1415_v26, %v213_v28  ;;  %v630_v28 = vld [vmem:[%s1742_s7 + $0x10] sm:$0xff] }
  0xdc   :  { %v489_v31 = vld [vmem:[%s1736_s1] sm:$0xff] }
  0xdd   :  { %vm247_vm3 = vcmp.ge.f32.partialorder %v174_v29, 1.0  ;;  %vm255_vm11 = vcmp.ge.f32.partialorder %v214_v6, 1.0  ;;  %v631_v29 = vld [vmem:[%s1742_s7 + $0x18] sm:$0xff] }
  0xde   :  { %v888_v32 = vsel %vm247_vm3, 1.0, %v1232_v4  ;;  %v178_v33 = vpop.f32.mrb[2].mxu0  ;;  %v218_v34 = vpop.f32.mrb[2].mxu1  ;;  %v896_v13 = vsel %vm255_vm11, 1.0, %v1232_v4  ;;  %v1173_v30 = vpack.c.bf16 %v631_v29, %v630_v28 }
  0xdf   :  { %1063 = vmatmul.mubr.msk.f32.vlgmr.msra.gmra.mrb[14].mxu1 %vm303_vm2, %v888_v32  ;;  %v179_v35 = vadd.f32 %v1415_v26, %v178_v33  ;;  %v1014_v36 = vpop.f32.mrb[3].mxu0  ;;  %v1038_v37 = vpop.f32.mrb[3].mxu1  ;;  %v219_v11 = vadd.f32 %v1415_v26, %v218_v34  ;;  %v490_v32 = vld [vmem:[%s1737_s2] sm:$0xff] }
  0xe0   :  { %1065 = vmatprep.mubr.msk.f32.mxu1 %vm1231_vm0, %v1232_v4  ;;  %v491_v33 = vmul.f32 %v490_v32, %v489_v31  ;;  %v1512_v34 = vld [vmem:[%s1741_s6] ss:$0 sm:$0xff] }
  0xe1   :  { %vm248_vm4 = vcmp.ge.f32.partialorder %v179_v35, 1.0  ;;  %vm256_vm12 = vcmp.ge.f32.partialorder %v219_v11, 1.0 }
  0xe2   :  { %v889_v38 = vsel %vm248_vm4, 1.0, %v1232_v4  ;;  %v183_v39 = vpop.f32.mrb[4].mxu0  ;;  %v223_v40 = vpop.f32.mrb[4].mxu1  ;;  %v897_v15 = vsel %vm256_vm12, 1.0, %v1232_v4 }
  0xe3   :  { %1066 = vmatmul.mubr.msk.f32.gmra.mrb[16].mxu1 %vm303_vm2, %v889_v38  ;;  %v184_v41 = vadd.f32 %v1415_v26, %v183_v39  ;;  %v1017_v42 = vpop.f32.mrb[5].mxu0  ;;  %v1041_v43 = vpop.f32.mrb[5].mxu1  ;;  %v224_v14 = vadd.f32 %v1415_v26, %v223_v40 }
  0xe4   :  { %1068 = vmatprep.mubr.msk.f32.mxu1 %vm1231_vm0, %v1232_v4 }
  0xe5   :  { %vm249_vm5 = vcmp.ge.f32.partialorder %v184_v41, 1.0  ;;  %vm257_vm13 = vcmp.ge.f32.partialorder %v224_v14, 1.0 }
  0xe6   :  { %v890_v44 = vsel %vm249_vm5, 1.0, %v1232_v4  ;;  %v188_v45 = vpop.f32.mrb[6].mxu0  ;;  %v228_v46 = vpop.f32.mrb[6].mxu1  ;;  %v898_v17 = vsel %vm257_vm13, 1.0, %v1232_v4 }
  0xe7   :  { %1069 = vmatmul.mubr.msk.f32.gmra.mrb[18].mxu1 %vm303_vm2, %v890_v44  ;;  %v189_v47 = vadd.f32 %v1415_v26, %v188_v45  ;;  %v1020_v48 = vpop.f32.mrb[7].mxu0  ;;  %v1044_v49 = vpop.f32.mrb[7].mxu1  ;;  %v229_v16 = vadd.f32 %v1415_v26, %v228_v46 }
  0xe8   :  { %1071 = vmatprep.mubr.msk.f32.mxu1 %vm1231_vm0, %v1232_v4 }
  0xe9   :  { %vm250_vm6 = vcmp.ge.f32.partialorder %v189_v47, 1.0  ;;  %vm258_vm14 = vcmp.ge.f32.partialorder %v229_v16, 1.0 }
  0xea   :  { %v891_v50 = vsel %vm250_vm6, 1.0, %v1232_v4  ;;  %v193_v51 = vpop.f32.mrb[8].mxu0  ;;  %v233_v52 = vpop.f32.mrb[8].mxu1  ;;  %v899_v19 = vsel %vm258_vm14, 1.0, %v1232_v4 }
  0xeb   :  { %1072 = vmatmul.mubr.msk.f32.gmra.mrb[20].mxu1 %vm303_vm2, %v891_v50  ;;  %v194_v53 = vadd.f32 %v1415_v26, %v193_v51  ;;  %v1023_v54 = vpop.f32.mrb[9].mxu0  ;;  %v1047_v55 = vpop.f32.mrb[9].mxu1  ;;  %v234_v18 = vadd.f32 %v1415_v26, %v233_v52 }
  0xec   :  { %1074 = vmatprep.mubr.msk.f32.mxu1 %vm1231_vm0, %v1232_v4 }
  0xed   :  { %vm251_vm7 = vcmp.ge.f32.partialorder %v194_v53, 1.0  ;;  %vm259_vm15 = vcmp.ge.f32.partialorder %v234_v18, 1.0 }
  0xee   :  { %v892_v56 = vsel %vm251_vm7, 1.0, %v1232_v4  ;;  %v198_v57 = vpop.f32.mrb[10].mxu0  ;;  %v238_v58 = vpop.f32.mrb[10].mxu1  ;;  %v900_v21 = vsel %vm259_vm15, 1.0, %v1232_v4 }
  0xef   :  { %1075 = vmatmul.mubr.msk.f32.gmra.mrb[22].mxu1 %vm303_vm2, %v892_v56  ;;  %v199_v59 = vadd.f32 %v1415_v26, %v198_v57  ;;  %v1026_v60 = vpop.f32.mrb[11].mxu0  ;;  %v1050_v61 = vpop.f32.mrb[11].mxu1  ;;  %v239_v20 = vadd.f32 %v1415_v26, %v238_v58 }
  0xf0   :  { %1077 = vmatprep.mubr.msk.f32.mxu1 %vm1231_vm0, %v1232_v4 }
  0xf1   :  { %vm252_vm8 = vcmp.ge.f32.partialorder %v199_v59, 1.0  ;;  %vm260_vm1 = vcmp.ge.f32.partialorder %v239_v20, 1.0 }
  0xf2   :  { %v893_v62 = vsel %vm252_vm8, 1.0, %v1232_v4  ;;  %v203_v63 = vpop.f32.mrb[12].mxu0  ;;  %v243_v0 = vpop.f32.mrb[12].mxu1  ;;  %v901_v23 = vsel %vm260_vm1, 1.0, %v1232_v4 }
  0xf3   :  { %1078 = vmatmul.mubr.msk.f32.gmra.mrb[24].mxu1 %vm303_vm2, %v893_v62  ;;  %v204_v1 = vadd.f32 %v1415_v26, %v203_v63  ;;  %v1029_v3 = vpop.f32.mrb[13].mxu0  ;;  %v1053_v5 = vpop.f32.mrb[13].mxu1  ;;  %v244_v22 = vadd.f32 %v1415_v26, %v243_v0 }
  0xf4   :  { %1080 = vmatprep.mubr.msk.f32.mxu1 %vm1231_vm0, %v1232_v4 }
  0xf5   :  { %vm253_vm9 = vcmp.ge.f32.partialorder %v204_v1, 1.0  ;;  %vm261_vm3 = vcmp.ge.f32.partialorder %v244_v22, 1.0 }
  0xf6   :  { %v894_v7 = vsel %vm253_vm9, 1.0, %v1232_v4  ;;  %v208_v8 = vpop.f32.mrb[14].mxu0  ;;  %v902_v24 = vsel %vm261_vm3, 1.0, %v1232_v4 }
  0xf7   :  { %1081 = vmatmul.mubr.msk.f32.gmra.mrb[26].mxu1 %vm303_vm2, %v894_v7  ;;  %v209_v9 = vadd.f32 %v1415_v26, %v208_v8  ;;  %v1032_v10 = vpop.f32.mrb[15].mxu0  ;;  %v629_v26 = vld [vmem:[%s1742_s7 + $0x8] sm:$0xff] }
  0xf8   :  { %1083 = vmatprep.mubr.msk.f32.mxu1 %vm1231_vm0, %v1232_v4  ;;  %v1170_v27 = vpack.c.bf16 %v629_v26, %v628_v25 }
  0xf9   :  { %vm254_vm10 = vcmp.ge.f32.partialorder %v209_v9, 1.0 }
  0xfa   :  { %v895_v12 = vsel %vm254_vm10, 1.0, %v1232_v4  ;;  %1171 = vmatpush3.bf16.msra.mxu0 %v1170_v27 }
  0xfb   :  { %1084 = vmatmul.mubr.msk.f32.gmra.mrb[28].mxu1 %vm303_vm2, %v895_v12  ;;  %1172 = vmatprep.subr.bf16.mxu0 %v1230_v2  ;;  %v492_v2 = vsub.f32 %v489_v31, %v491_v33 }
  0xfc   :  { %1086 = vmatprep.mubr.msk.f32.mxu1 %vm1231_vm0, %v1232_v4 }
  0xfd   :  { %v493_v35 = vmul.f32 0.3, %v492_v2 }
  0xfe   :  { %1174 = vmatpush3.bf16.msra.mxu0 %v1173_v30 }
  0xff   :  { %1087 = vmatmul.mubr.msk.f32.gmra.mrb[30].mxu1 %vm303_vm2, %v896_v13 }
 0x100   :  { %1089 = vmatprep.mubr.msk.f32.mxu1 %vm1231_vm0, %v1232_v4 }
 0x103   :  { %1090 = vmatmul.mubr.msk.f32.gmra.mrb[32].mxu1 %vm303_vm2, %v897_v15 }
 0x104   :  { %1092 = vmatprep.mubr.msk.f32.mxu1 %vm1231_vm0, %v1232_v4 }
 0x107   :  { %1093 = vmatmul.mubr.msk.f32.gmra.mrb[34].mxu1 %vm303_vm2, %v898_v17 }
 0x108   :  { %1095 = vmatprep.mubr.msk.f32.mxu1 %vm1231_vm0, %v1232_v4 }
 0x10b   :  { %1096 = vmatmul.mubr.msk.f32.gmra.mrb[36].mxu1 %vm303_vm2, %v899_v19 }
 0x10c   :  { %1098 = vmatprep.mubr.msk.f32.mxu1 %vm1231_vm0, %v1232_v4 }
 0x10f   :  { %1099 = vmatmul.mubr.msk.f32.gmra.mrb[38].mxu1 %vm303_vm2, %v900_v21 }
 0x110   :  { %1101 = vmatprep.mubr.msk.f32.mxu1 %vm1231_vm0, %v1232_v4 }
 0x113   :  { %1102 = vmatmul.mubr.msk.f32.gmra.mrb[40].mxu1 %vm303_vm2, %v901_v23 }
 0x114   :  { %1104 = vmatprep.mubr.msk.f32.mxu1 %vm1231_vm0, %v1232_v4 }
 0x117   :  { %1105 = vmatmul.mubr.msk.f32.gmra.mrb[42].mxu1 %vm303_vm2, %v902_v24 }
 0x1b2   :  { %v415_v36 = vpop.f32.mrb[14].mxu1 }
 0x1b3   :  { %v416_v37 = vadd.f32 %v1512_v34, %v415_v36  ;;  %v1064_v38 = vpop.f32.mrb[15].mxu1 }
 0x1b5   :  { %v494_v39 = vadd.f32 %v493_v35, %v416_v37 }
 0x1b6   :  { %v420_v40 = vpop.f32.mrb[16].mxu1 }
 0x1b7   :  { %498 = vst.msk [vmem:[#allocation2] sm:$0xff] %vm303_vm2, %v494_v39  ;;  %vm495_vm4 = vcmp.gt.f32.partialorder %v494_v39, 1.0  ;;  %v1067_v41 = vpop.f32.mrb[17].mxu1  ;;  %v421_v45 = vadd.f32 %v1512_v34, %v420_v40 }
 0x1b8   :  { %v919_v42 = vsel %vm495_vm4, 1.0, %v1232_v4 }
 0x1b9   :  { %v499_v43 = vmul.f32 %v919_v42, %v494_v39 }
 0x1ba   :  { %v425_v44 = vpop.f32.mrb[18].mxu1 }
 0x1bb   :  { %v500_v46 = vsub.f32 %v494_v39, %v499_v43  ;;  %v1070_v47 = vpop.f32.mrb[19].mxu1  ;;  %v426_v57 = vadd.f32 %v1512_v34, %v425_v44 }
 0x1bd   :  { %v501_v48 = vmul.f32 0.3, %v500_v46 }
 0x1be   :  { %v613_v49 = vld [vmem:[#allocation2] sm:$0xff]  ;;  %v430_v50 = vpop.f32.mrb[20].mxu1 }
 0x1bf   :  { %v502_v51 = vadd.f32 %v501_v48, %v421_v45  ;;  %1116 = vmatmul.mubr.msk.f32.vlgmr.msra.gmra.mrb[16].mxu0 %vm303_vm2, %v613_v49  ;;  %v1073_v52 = vpop.f32.mrb[21].mxu1  ;;  %v431_v7 = vadd.f32 %v1512_v34, %v430_v50 }
 0x1c0   :  { %1118 = vmatprep.mubr.msk.f32.mxu0 %vm1231_vm0, %v1232_v4 }
 0x1c1   :  { %506 = vst.msk [vmem:[#allocation2 + $0x8] sm:$0xff] %vm303_vm2, %v502_v51  ;;  %vm503_vm5 = vcmp.gt.f32.partialorder %v502_v51, 1.0 }
 0x1c2   :  { %v920_v53 = vsel %vm503_vm5, 1.0, %v1232_v4  ;;  %v435_v54 = vpop.f32.mrb[22].mxu1  ;;  %vm824_vm5 = vcmask 39936  }
 0x1c3   :  { %v507_v55 = vmul.f32 %v920_v53, %v502_v51  ;;  %v1076_v56 = vpop.f32.mrb[23].mxu1  ;;  %v436_v22 = vadd.f32 %v1512_v34, %v435_v54 }
 0x1c5   :  { %v508_v58 = vsub.f32 %v502_v51, %v507_v55 }
 0x1c6   :  { %v440_v59 = vpop.f32.mrb[24].mxu1 }
 0x1c7   :  { %v509_v60 = vmul.f32 0.3, %v508_v58  ;;  %v1079_v61 = vpop.f32.mrb[25].mxu1  ;;  %v441_v36 = vadd.f32 %v1512_v34, %v440_v59 }
 0x1c8   :  { %v614_v62 = vld [vmem:[#allocation2 + $0x8] sm:$0xff] }
 0x1c9   :  { %v510_v63 = vadd.f32 %v509_v60, %v426_v57  ;;  %1119 = vmatmul.mubr.msk.f32.gmra.mrb[18].mxu0 %vm303_vm2, %v614_v62 }
 0x1ca   :  { %1121 = vmatprep.mubr.msk.f32.mxu0 %vm1231_vm0, %v1232_v4  ;;  %v1527_v0 = vpop.f32.mrb[26].mxu1 }
 0x1cb   :  { %514 = vst.msk [vmem:[#allocation2 + $0x10] sm:$0xff] %vm303_vm2, %v510_v63  ;;  %vm511_vm6 = vcmp.gt.f32.partialorder %v510_v63, 1.0  ;;  %v1082_v1 = vpop.f32.mrb[27].mxu1  ;;  %v446_v51 = vadd.f32 %v1512_v34, %v1527_v0 }
 0x1cc   :  { %v921_v3 = vsel %vm511_vm6, 1.0, %v1232_v4 }
 0x1cd   :  { %v515_v5 = vmul.f32 %v921_v3, %v510_v63 }
 0x1ce   :  { %v450_v6 = vpop.f32.mrb[28].mxu1 }
 0x1cf   :  { %v516_v8 = vsub.f32 %v510_v63, %v515_v5  ;;  %v1533_v9 = vadd.f32 %v1512_v34, %v450_v6  ;;  %v1085_v10 = vpop.f32.mrb[29].mxu1 }
 0x1d1   :  { %v517_v11 = vmul.f32 0.3, %v516_v8 }
 0x1d2   :  { %v615_v12 = vld [vmem:[#allocation2 + $0x10] sm:$0xff]  ;;  %v455_v13 = vpop.f32.mrb[30].mxu1 }
 0x1d3   :  { %v518_v14 = vadd.f32 %v517_v11, %v431_v7  ;;  %1122 = vmatmul.mubr.msk.f32.gmra.mrb[20].mxu0 %vm303_vm2, %v615_v12  ;;  %v1537_v15 = vadd.f32 %v1512_v34, %v455_v13  ;;  %v1088_v16 = vpop.f32.mrb[31].mxu1 }
 0x1d4   :  { %1124 = vmatprep.mubr.msk.f32.mxu0 %vm1231_vm0, %v1232_v4 }
 0x1d5   :  { %522 = vst.msk [vmem:[#allocation2 + $0x18] sm:$0xff] %vm303_vm2, %v518_v14  ;;  %vm519_vm7 = vcmp.gt.f32.partialorder %v518_v14, 1.0 }
 0x1d6   :  { %v922_v17 = vsel %vm519_vm7, 1.0, %v1232_v4  ;;  %v460_v18 = vpop.f32.mrb[32].mxu1 }
 0x1d7   :  { %v523_v19 = vmul.f32 %v922_v17, %v518_v14  ;;  %v1544_v20 = vadd.f32 %v1512_v34, %v460_v18  ;;  %v1091_v21 = vpop.f32.mrb[33].mxu1 }
 0x1d9   :  { %v524_v23 = vsub.f32 %v518_v14, %v523_v19 }
 0x1da   :  { %v465_v24 = vpop.f32.mrb[34].mxu1 }
 0x1db   :  { %v525_v25 = vmul.f32 0.3, %v524_v23  ;;  %v1548_v26 = vadd.f32 %v1512_v34, %v465_v24  ;;  %v1094_v27 = vpop.f32.mrb[35].mxu1 }
 0x1dc   :  { %v616_v28 = vld [vmem:[#allocation2 + $0x18] sm:$0xff] }
 0x1dd   :  { %v526_v29 = vadd.f32 %v525_v25, %v436_v22  ;;  %1125 = vmatmul.mubr.msk.f32.gmra.mrb[22].mxu0 %vm303_vm2, %v616_v28 }
 0x1de   :  { %1127 = vmatprep.mubr.msk.f32.mxu0 %vm1231_vm0, %v1232_v4  ;;  %v470_v30 = vpop.f32.mrb[36].mxu1 }
 0x1df   :  { %530 = vst.msk [vmem:[#allocation2 + $0x20] sm:$0xff] %vm303_vm2, %v526_v29  ;;  %vm527_vm8 = vcmp.gt.f32.partialorder %v526_v29, 1.0  ;;  %v1555_v31 = vadd.f32 %v1512_v34, %v470_v30  ;;  %v1097_v32 = vpop.f32.mrb[37].mxu1 }
 0x1e0   :  { %v923_v33 = vsel %vm527_vm8, 1.0, %v1232_v4 }
 0x1e1   :  { %v531_v2 = vmul.f32 %v923_v33, %v526_v29 }
 0x1e2   :  { %v475_v35 = vpop.f32.mrb[38].mxu1 }
 0x1e3   :  { %v532_v37 = vsub.f32 %v526_v29, %v531_v2  ;;  %v1560_v38 = vadd.f32 %v1512_v34, %v475_v35  ;;  %v1100_v39 = vpop.f32.mrb[39].mxu1 }
 0x1e5   :  { %v533_v40 = vmul.f32 0.3, %v532_v37 }
 0x1e6   :  { %v617_v41 = vld [vmem:[#allocation2 + $0x20] sm:$0xff]  ;;  %v480_v42 = vpop.f32.mrb[40].mxu1 }
 0x1e7   :  { %v534_v43 = vadd.f32 %v533_v40, %v441_v36  ;;  %1128 = vmatmul.mubr.msk.f32.gmra.mrb[24].mxu0 %vm303_vm2, %v617_v41  ;;  %v1564_v44 = vadd.f32 %v1512_v34, %v480_v42  ;;  %v1103_v45 = vpop.f32.mrb[41].mxu1 }
 0x1e8   :  { %1130 = vmatprep.mubr.msk.f32.mxu0 %vm1231_vm0, %v1232_v4 }
 0x1e9   :  { %538 = vst.msk [vmem:[#allocation2 + $0x28] sm:$0xff] %vm303_vm2, %v534_v43  ;;  %vm535_vm9 = vcmp.gt.f32.partialorder %v534_v43, 1.0 }
 0x1ea   :  { %v924_v46 = vsel %vm535_vm9, 1.0, %v1232_v4  ;;  %v485_v47 = vpop.f32.mrb[42].mxu1 }
 0x1eb   :  { %v539_v48 = vmul.f32 %v924_v46, %v534_v43  ;;  %v1571_v49 = vadd.f32 %v1512_v34, %v485_v47  ;;  %v1106_v50 = vpop.f32.mrb[43].mxu1 }
 0x1ed   :  { %v540_v52 = vsub.f32 %v534_v43, %v539_v48  ;;  %v1634_v43 = vld [vmem:[%s1743_s8] ss:$0 sm:$0xff]  ;;  %s1233_s8 = smov [#allocation3]  }
 0x1ee   :  { %s848_s13 = sshll.u32 %s1233_s8, 4  ;;  %s849_s13 = int_to_ptr.vmem [resolvable:$true] %s848_s13 }
 0x1ef   :  { %v541_v53 = vmul.f32 0.3, %v540_v52  ;;  %s1182_s16 = scalar_lea.vmem %s849_s13, 128  ;;  %p1187_p1 = scmp.lt.s32.totalorder %s849_s13, %s849_s13 }
 0x1f0   :  { %v618_v54 = vld [vmem:[#allocation2 + $0x28] sm:$0xff]  ;;  %p1183_p0 = scmp.ne.s32.totalorder %s849_s13, %s1182_s16  ;;  %p1188_p2 = scmp.lt.s32.totalorder %s1182_s16, %s1182_s16 }
 0x1f1   :  { %v542_v55 = vadd.f32 %v541_v53, %v446_v51  ;;  %1131 = vmatmul.mubr.msk.f32.gmra.mrb[26].mxu0 %vm303_vm2, %v618_v54 }
 0x1f2   :  { %1133 = vmatprep.mubr.msk.f32.mxu0 %vm1231_vm0, %v1232_v4  ;;  %p1189_p3 = por %p1188_p2, %p1187_p1 }
 0x1f3   :  { %546 = vst.msk [vmem:[#allocation2 + $0x30] sm:$0xff] %vm303_vm2, %v542_v55  ;;  %vm543_vm10 = vcmp.gt.f32.partialorder %v542_v55, 1.0 }
 0x1f4   :  { %v925_v56 = vsel %vm543_vm10, 1.0, %v1232_v4  ;;  %p1190_p4 = pnand %p1189_p3, %p1183_p0 }
 0x1f5   :  { %v547_v57 = vmul.f32 %v925_v56, %v542_v55 }
 0x1f7   :  { %v548_v58 = vsub.f32 %v542_v55, %v547_v57 }
 0x1f9   :  { %v549_v59 = vmul.f32 0.3, %v548_v58 }
 0x1fa   :  { %v619_v60 = vld [vmem:[#allocation2 + $0x30] sm:$0xff] }
 0x1fb   :  { %v550_v34 = vadd.f32 %v549_v59, %v1533_v9  ;;  %1134 = vmatmul.mubr.msk.f32.gmra.mrb[28].mxu0 %vm303_vm2, %v619_v60 }
 0x1fc   :  { %1136 = vmatprep.mubr.msk.f32.mxu0 %vm1231_vm0, %v1232_v4 }
 0x1fd   :  { %554 = vst.msk [vmem:[#allocation2 + $0x38] sm:$0xff] %vm303_vm2, %v550_v34  ;;  %vm551_vm11 = vcmp.gt.f32.partialorder %v550_v34, 1.0 }
 0x1fe   :  { %v926_v61 = vsel %vm551_vm11, 1.0, %v1232_v4 }
 0x1ff   :  { %v555_v62 = vmul.f32 %v926_v61, %v550_v34 }
 0x201   :  { %v556_v63 = vsub.f32 %v550_v34, %v555_v62 }
 0x203   :  { %v557_v0 = vmul.f32 0.3, %v556_v63 }
 0x204   :  { %v620_v1 = vld [vmem:[#allocation2 + $0x38] sm:$0xff] }
 0x205   :  { %v558_v3 = vadd.f32 %v557_v0, %v1537_v15  ;;  %1137 = vmatmul.mubr.msk.f32.gmra.mrb[30].mxu0 %vm303_vm2, %v620_v1 }
 0x206   :  { %1139 = vmatprep.mubr.msk.f32.mxu0 %vm1231_vm0, %v1232_v4 }
 0x207   :  { %562 = vst.msk [vmem:[#allocation2 + $0x40] sm:$0xff] %vm303_vm2, %v558_v3  ;;  %vm559_vm12 = vcmp.gt.f32.partialorder %v558_v3, 1.0 }
 0x208   :  { %v927_v5 = vsel %vm559_vm12, 1.0, %v1232_v4 }
 0x209   :  { %v563_v6 = vmul.f32 %v927_v5, %v558_v3 }
 0x20b   :  { %v564_v7 = vsub.f32 %v558_v3, %v563_v6 }
 0x20d   :  { %v565_v8 = vmul.f32 0.3, %v564_v7 }
 0x20e   :  { %v621_v9 = vld [vmem:[#allocation2 + $0x40] sm:$0xff] }
 0x20f   :  { %v566_v10 = vadd.f32 %v565_v8, %v1544_v20  ;;  %1140 = vmatmul.mubr.msk.f32.gmra.mrb[32].mxu0 %vm303_vm2, %v621_v9 }
 0x210   :  { %1142 = vmatprep.mubr.msk.f32.mxu0 %vm1231_vm0, %v1232_v4 }
 0x211   :  { %570 = vst.msk [vmem:[#allocation2 + $0x48] sm:$0xff] %vm303_vm2, %v566_v10  ;;  %vm567_vm13 = vcmp.gt.f32.partialorder %v566_v10, 1.0 }
 0x212   :  { %v928_v11 = vsel %vm567_vm13, 1.0, %v1232_v4 }
 0x213   :  { %v571_v12 = vmul.f32 %v928_v11, %v566_v10 }
 0x215   :  { %v572_v13 = vsub.f32 %v566_v10, %v571_v12 }
 0x217   :  { %v573_v14 = vmul.f32 0.3, %v572_v13 }
 0x218   :  { %v622_v15 = vld [vmem:[#allocation2 + $0x48] sm:$0xff] }
 0x219   :  { %v574_v16 = vadd.f32 %v573_v14, %v1548_v26  ;;  %1143 = vmatmul.mubr.msk.f32.gmra.mrb[34].mxu0 %vm303_vm2, %v622_v15 }
 0x21a   :  { %1145 = vmatprep.mubr.msk.f32.mxu0 %vm1231_vm0, %v1232_v4 }
 0x21b   :  { %578 = vst.msk [vmem:[#allocation2 + $0x50] sm:$0xff] %vm303_vm2, %v574_v16  ;;  %vm575_vm14 = vcmp.gt.f32.partialorder %v574_v16, 1.0 }
 0x21c   :  { %v929_v17 = vsel %vm575_vm14, 1.0, %v1232_v4 }
 0x21d   :  { %v579_v18 = vmul.f32 %v929_v17, %v574_v16 }
 0x21f   :  { %v580_v19 = vsub.f32 %v574_v16, %v579_v18 }
 0x221   :  { %v581_v20 = vmul.f32 0.3, %v580_v19 }
 0x222   :  { %v623_v21 = vld [vmem:[#allocation2 + $0x50] sm:$0xff] }
 0x223   :  { %v582_v22 = vadd.f32 %v581_v20, %v1555_v31  ;;  %1146 = vmatmul.mubr.msk.f32.gmra.mrb[36].mxu0 %vm303_vm2, %v623_v21 }
 0x224   :  { %1148 = vmatprep.mubr.msk.f32.mxu0 %vm1231_vm0, %v1232_v4 }
 0x225   :  { %586 = vst.msk [vmem:[#allocation2 + $0x58] sm:$0xff] %vm303_vm2, %v582_v22  ;;  %vm583_vm15 = vcmp.gt.f32.partialorder %v582_v22, 1.0 }
 0x226   :  { %v930_v23 = vsel %vm583_vm15, 1.0, %v1232_v4 }
 0x227   :  { %v587_v24 = vmul.f32 %v930_v23, %v582_v22 }
 0x229   :  { %v588_v25 = vsub.f32 %v582_v22, %v587_v24 }
 0x22b   :  { %v589_v26 = vmul.f32 0.3, %v588_v25 }
 0x22c   :  { %v624_v27 = vld [vmem:[#allocation2 + $0x58] sm:$0xff] }
 0x22d   :  { %v590_v28 = vadd.f32 %v589_v26, %v1560_v38  ;;  %1149 = vmatmul.mubr.msk.f32.gmra.mrb[38].mxu0 %vm303_vm2, %v624_v27 }
 0x22e   :  { %1151 = vmatprep.mubr.msk.f32.mxu0 %vm1231_vm0, %v1232_v4 }
 0x22f   :  { %594 = vst.msk [vmem:[#allocation2 + $0x60] sm:$0xff] %vm303_vm2, %v590_v28  ;;  %vm591_vm1 = vcmp.gt.f32.partialorder %v590_v28, 1.0 }
 0x230   :  { %v931_v29 = vsel %vm591_vm1, 1.0, %v1232_v4 }
 0x231   :  { %v595_v30 = vmul.f32 %v931_v29, %v590_v28 }
 0x233   :  { %v596_v31 = vsub.f32 %v590_v28, %v595_v30 }
 0x235   :  { %v597_v32 = vmul.f32 0.3, %v596_v31 }
 0x236   :  { %v625_v33 = vld [vmem:[#allocation2 + $0x60] sm:$0xff] }
 0x237   :  { %v598_v2 = vadd.f32 %v597_v32, %v1564_v44  ;;  %1152 = vmatmul.mubr.msk.f32.gmra.mrb[40].mxu0 %vm303_vm2, %v625_v33 }
 0x238   :  { %1154 = vmatprep.mubr.msk.f32.mxu0 %vm1231_vm0, %v1232_v4 }
 0x239   :  { %602 = vst.msk [vmem:[#allocation2 + $0x68] sm:$0xff] %vm303_vm2, %v598_v2  ;;  %vm599_vm3 = vcmp.gt.f32.partialorder %v598_v2, 1.0 }
 0x23a   :  { %v932_v35 = vsel %vm599_vm3, 1.0, %v1232_v4 }
 0x23b   :  { %v603_v36 = vmul.f32 %v932_v35, %v598_v2 }
 0x23d   :  { %v604_v37 = vsub.f32 %v598_v2, %v603_v36 }
 0x23f   :  { %v605_v38 = vmul.f32 0.3, %v604_v37 }
 0x240   :  { %v626_v39 = vld [vmem:[#allocation2 + $0x68] sm:$0xff] }
 0x241   :  { %v606_v40 = vadd.f32 %v605_v38, %v1571_v49  ;;  %1155 = vmatmul.mubr.msk.f32.gmra.mrb[42].mxu0 %vm303_vm2, %v626_v39 }
 0x242   :  { %1157 = vmatprep.mubr.msk.f32.mxu0 %vm1231_vm0, %v1232_v4 }
 0x243   :  { %610 = vst.msk [vmem:[#allocation2 + $0x70] sm:$0xff] %vm303_vm2, %v606_v40  ;;  %611 = vst.msk [vmem:[#allocation3] sm:$0xff] %vm303_vm2, %v606_v40  ;;  %vm607_vm4 = vcmp.gt.f32.partialorder %v606_v40, 1.0 }
 0x244   :  { %v933_v41 = vsel %vm607_vm4, 1.0, %v1232_v4 }
 0x245   :  { %612 = vst.msk [vmem:[#allocation5] sm:$0xff] %vm303_vm2, %v933_v41 }
 0x24a   :  { %v627_v42 = vld [vmem:[#allocation2 + $0x70] sm:$0xff] }
 0x24b   :  { %1158 = vmatmul.mubr.msk.f32.gmra.mrb[44].mxu0 %vm303_vm2, %v627_v42 }
 0x292   :  { %v750_v44 = vpop.f32.mrb[16].mxu0 }
 0x293   :  { %v751_v45 = vadd.f32 %v1634_v43, %v750_v44  ;;  %v1117_v46 = vpop.f32.mrb[17].mxu0 }
 0x295   :  { %825 = vst.msk [vmem:[%s1744_s9] sm:$0xff] %vm824_vm5, %v751_v45 }
 0x29c   :  { %v755_v4 = vpop.f32.mrb[18].mxu0 }
 0x29d   :  { %v756_v47 = vadd.f32 %v1634_v43, %v755_v4  ;;  %v1120_v48 = vpop.f32.mrb[19].mxu0 }
 0x29f   :  { %826 = vst.msk [vmem:[%s1744_s9 + $0x8] sm:$0xff] %vm824_vm5, %v756_v47 }
 0x2a0   :  { %1193 = shalt.err (!%p1190_p4)
}
 0x2a1   :  { %s1194_s18 = scalar_lea.hbm %s1745_s10, 128 }
 0x2a2   :  { %p1195_p5 = scmp.ne.s32.totalorder %s1745_s10, %s1194_s18  ;;  %p1198_p6 = scmp.lt.u32.totalorder %s1194_s18, %s1745_s10 }
 0x2a4   :  { %p1200_p7 = pnand %p1198_p6, %p1195_p5 }
 0x2a6   :  { %1203 = shalt.err (!%p1200_p7)
}
 0x2a7   :  { %851 = dma.vmem_to_hbm [thread:$0]  %s849_s13, 128, %s1745_s10, [#allocation4]  }
 0x2a8   :  { %s1204_s3 = scalar_lea.vmem %s859_s15, 128  ;;  %p1209_p9 = scmp.lt.s32.totalorder %s859_s15, %s859_s15 }
 0x2a9   :  { %p1205_p8 = scmp.ne.s32.totalorder %s859_s15, %s1204_s3  ;;  %p1210_p10 = scmp.lt.s32.totalorder %s1204_s3, %s1204_s3 }
 0x2ab   :  { %p1211_p11 = por %p1210_p10, %p1209_p9 }
 0x2ad   :  { %p1212_p12 = pnand %p1211_p11, %p1205_p8 }
 0x2af   :  { %1215 = shalt.err (!%p1212_p12)
}
 0x2b0   :  { %s1216_s25 = scalar_lea.hbm %s1746_s11, 128 }
 0x2b1   :  { %p1217_p13 = scmp.ne.s32.totalorder %s1746_s11, %s1216_s25  ;;  %p1220_p0 = scmp.lt.u32.totalorder %s1216_s25, %s1746_s11 }
 0x2b3   :  { %p1222_p1 = pnand %p1220_p0, %p1217_p13 }
 0x2b5   :  { %1225 = shalt.err (!%p1222_p1)
}
 0x2b6   :  { %861 = dma.vmem_to_hbm [thread:$0]  %s859_s15, 128, %s1746_s11, [#allocation6]   ;;  %v760_v49 = vpop.f32.mrb[20].mxu0 }
 0x2b7   :  { %v761_v50 = vadd.f32 %v1634_v43, %v760_v49  ;;  %v1123_v51 = vpop.f32.mrb[21].mxu0 }
 0x2b8   :  { %v765_v52 = vpop.f32.mrb[22].mxu0 }
 0x2b9   :  { %827 = vst.msk [vmem:[%s1744_s9 + $0x10] sm:$0xff] %vm824_vm5, %v761_v50  ;;  %v766_v53 = vadd.f32 %v1634_v43, %v765_v52  ;;  %v1126_v54 = vpop.f32.mrb[23].mxu0 }
 0x2ba   :  { %v770_v55 = vpop.f32.mrb[24].mxu0 }
 0x2bb   :  { %828 = vst.msk [vmem:[%s1744_s9 + $0x18] sm:$0xff] %vm824_vm5, %v766_v53  ;;  %v771_v56 = vadd.f32 %v1634_v43, %v770_v55  ;;  %v1129_v57 = vpop.f32.mrb[25].mxu0 }
 0x2bd   :  { %829 = vst.msk [vmem:[%s1744_s9 + $0x20] sm:$0xff] %vm824_vm5, %v771_v56 }
 0x2c4   :  { %v775_v58 = vpop.f32.mrb[26].mxu0 }
 0x2c5   :  { %v776_v59 = vadd.f32 %v1634_v43, %v775_v58  ;;  %v1132_v60 = vpop.f32.mrb[27].mxu0 }
 0x2c7   :  { %830 = vst.msk [vmem:[%s1744_s9 + $0x28] sm:$0xff] %vm824_vm5, %v776_v59 }
 0x2ce   :  { %v780_v34 = vpop.f32.mrb[28].mxu0 }
 0x2cf   :  { %v781_v61 = vadd.f32 %v1634_v43, %v780_v34  ;;  %v1135_v62 = vpop.f32.mrb[29].mxu0 }
 0x2d1   :  { %831 = vst.msk [vmem:[%s1744_s9 + $0x30] sm:$0xff] %vm824_vm5, %v781_v61 }
 0x2d8   :  { %v785_v63 = vpop.f32.mrb[30].mxu0 }
 0x2d9   :  { %v786_v0 = vadd.f32 %v1634_v43, %v785_v63  ;;  %v1138_v1 = vpop.f32.mrb[31].mxu0 }
 0x2db   :  { %832 = vst.msk [vmem:[%s1744_s9 + $0x38] sm:$0xff] %vm824_vm5, %v786_v0 }
 0x2e2   :  { %v790_v3 = vpop.f32.mrb[32].mxu0 }
 0x2e3   :  { %v791_v5 = vadd.f32 %v1634_v43, %v790_v3  ;;  %v1141_v6 = vpop.f32.mrb[33].mxu0 }
 0x2e5   :  { %833 = vst.msk [vmem:[%s1744_s9 + $0x40] sm:$0xff] %vm824_vm5, %v791_v5 }
 0x2ec   :  { %v795_v7 = vpop.f32.mrb[34].mxu0 }
 0x2ed   :  { %v796_v8 = vadd.f32 %v1634_v43, %v795_v7  ;;  %v1144_v9 = vpop.f32.mrb[35].mxu0 }
 0x2ef   :  { %834 = vst.msk [vmem:[%s1744_s9 + $0x48] sm:$0xff] %vm824_vm5, %v796_v8 }
 0x2f6   :  { %v800_v10 = vpop.f32.mrb[36].mxu0 }
 0x2f7   :  { %v801_v11 = vadd.f32 %v1634_v43, %v800_v10  ;;  %v1147_v12 = vpop.f32.mrb[37].mxu0 }
 0x2f9   :  { %835 = vst.msk [vmem:[%s1744_s9 + $0x50] sm:$0xff] %vm824_vm5, %v801_v11 }
 0x300   :  { %v805_v13 = vpop.f32.mrb[38].mxu0 }
 0x301   :  { %v806_v14 = vadd.f32 %v1634_v43, %v805_v13  ;;  %v1150_v15 = vpop.f32.mrb[39].mxu0 }
 0x303   :  { %836 = vst.msk [vmem:[%s1744_s9 + $0x58] sm:$0xff] %vm824_vm5, %v806_v14 }
 0x30a   :  { %v810_v16 = vpop.f32.mrb[40].mxu0 }
 0x30b   :  { %v811_v17 = vadd.f32 %v1634_v43, %v810_v16  ;;  %v1153_v18 = vpop.f32.mrb[41].mxu0 }
 0x30d   :  { %837 = vst.msk [vmem:[%s1744_s9 + $0x60] sm:$0xff] %vm824_vm5, %v811_v17 }
 0x314   :  { %v815_v19 = vpop.f32.mrb[42].mxu0 }
 0x315   :  { %v816_v20 = vadd.f32 %v1634_v43, %v815_v19  ;;  %v1156_v21 = vpop.f32.mrb[43].mxu0 }
 0x317   :  { %838 = vst.msk [vmem:[%s1744_s9 + $0x68] sm:$0xff] %vm824_vm5, %v816_v20 }
 0x31e   :  { %v820_v22 = vpop.f32.mrb[44].mxu0 }
 0x31f   :  { %v821_v23 = vadd.f32 %v1634_v43, %v820_v22  ;;  %v1159_v24 = vpop.f32.mrb[45].mxu0 }
 0x321   :  { %839 = vst.msk [vmem:[%s1744_s9 + $0x70] sm:$0xff] %vm824_vm5, %v821_v23 }
 0x322   :  { %1226 = dma.done.wait [#allocation4], 128  }
 0x323   :  { %1227 = vsyncadd [#allocation4], 4294967168 }
 0x324   :  { %1228 = dma.done.wait [#allocation6], 128  }
 0x325   :  { %1229 = vsyncadd [#allocation6], 4294967168 }
 0x326   :  { %870 = vsyncpa [#allocation4], 1 }
 0x327   :  { %871 = vsyncpa [#allocation6], 1 }

</bundles_post_ra>
